<compile_context>
chip_gen: v6e
topology: v6e:2x2x1
jax: 0.10.0
libtpu: 0.0.40
codegen_flags: <defaults>
</compile_context>

<pallas_src>
import functools
import math

import jax
import jax.numpy as jnp
from jax.experimental import pallas as pl
from jax.experimental.pallas import tpu as pltpu

_NEG_INF = -1e30
_LEAKY_SLOPE = 0.2                     # GATConv default negative_slope
_VMEM_LIMIT = 32 * 1024 * 1024         # safe on v5e/v6e/v7x (v7x: 64 MiB phys)


def _round_up(v, m):
    return ((v + m - 1) // m) * m


def _pick_tiles(n):
    """Padded node count and (dest/tq, source/tk) tile sizes.

    In the transposed layout tq/tk are LANE dims, so they must be multiples of
    128 (or full).  Always keep >= 2 row tiles so the "parallel" axis can be
    split across v7x's two TensorCores.
    """
    if n <= 256:
        return 256, 128, 256
    npad = _round_up(n, 512)
    return npad, 256, 512


# ----------------------------------------------------------------------------
# Kernel 1 (transposed projection):
#   accT[H*C, tq] = W^T @ elu(xT)      (bf16 MXU, f32 accumulate)
#   at finalize: xlT = accT (bf16) and aT[2H, tq] = A^T @ accT  (coefficients)
# ----------------------------------------------------------------------------
def _gat_proj_kernel(xT_ref, wT_ref, attT_ref, xlT_ref, aT_ref, acc_ref,
                     *, apply_elu):
    k = pl.program_id(1)

    @pl.when(k == 0)
    def _():
        acc_ref[...] = jnp.zeros_like(acc_ref)

    x = xT_ref[...].astype(jnp.float32)                    # [kf, tq]
    if apply_elu:
        # F.elu on the previous layer's output (exp argument clamped <= 0).
        x = jnp.where(x > 0, x, jnp.exp(jnp.minimum(x, 0.0)) - 1.0)
    acc_ref[...] += jnp.dot(wT_ref[...], x.astype(jnp.bfloat16),
                            preferred_element_type=jnp.float32)

    @pl.when(k == pl.num_programs(1) - 1)
    def _():
        acc = acc_ref[...]                                 # [H*C, tq] f32
        xlT_ref[...] = acc.astype(xlT_ref.dtype)           # bf16 for attention
        # One small MXU matmul replaces 2H cross-lane reductions:
        # aT[0:H] = a_src^T, aT[H:2H] = a_dst^T  (lane-dense [2H, tq] store).
        aT_ref[...] = jnp.dot(attT_ref[...], acc,
                              preferred_element_type=jnp.float32)


# ----------------------------------------------------------------------------
# Kernel 2 (source-major masked attention, online softmax, deferred norm).
#   grid = (dest row tiles "parallel", source tiles "arbitrary")
# ----------------------------------------------------------------------------
def _gat_attn_kernel(cnt_ref, a_src_ref, a_dstT_ref, adjT_ref, xlT_ref,
                     bias_ref, out_ref, m_scr, l_scr, acc_scr,
                     *, heads, out_ch, concat, approx_recip):
    i = pl.program_id(0)
    j = pl.program_id(1)
    nj = pl.num_programs(1)

    @pl.when(j == 0)
    def _():
        m_scr[...] = jnp.full(m_scr.shape, _NEG_INF, jnp.float32)
        l_scr[...] = jnp.zeros_like(l_scr)
        acc_scr[...] = jnp.zeros_like(acc_scr)

    # Skip the whole per-head update when this (row-tile, src-tile) block of
    # the adjacency is empty (counts are scalar-prefetched into SMEM).
    @pl.when(cnt_ref[i * nj + j] > 0)
    def _():
        valid = adjT_ref[...] != 0                          # [tk, tq] (int8)
        xlT = xlT_ref[...]                                  # [H*C, tk] bf16

        for h in range(heads):                              # heads small, static
            c0 = h * out_ch
            # sT[k, q] = a_src[node k] + a_dst[node q]
            s = a_src_ref[:, h:h + 1] + a_dstT_ref[h:h + 1, :]   # [tk, tq]
            s = jnp.maximum(s, _LEAKY_SLOPE * s)                 # LeakyReLU(0.2)
            s = jnp.where(valid, s, _NEG_INF)                    # mask once

            m_prev = m_scr[h:h + 1, :]                           # [1, tq]
            m_new = jnp.maximum(m_prev, jnp.max(s, axis=0, keepdims=True))
            # exp(NEG_INF - finite) underflows to exactly 0; any garbage
            # accumulated while m == NEG_INF is annihilated later by
            # scale = exp(NEG_INF - finite) = 0, so no second mask is needed.
            p = jnp.exp(s - m_new)                               # [tk, tq]
            scale = jnp.exp(m_prev - m_new)                      # [1, tq]

            l_scr[h:h + 1, :] = (scale * l_scr[h:h + 1, :]
                                 + jnp.sum(p, axis=0, keepdims=True))
            acc_scr[c0:c0 + out_ch, :] = (
                scale * acc_scr[c0:c0 + out_ch, :]
                + jnp.dot(xlT[c0:c0 + out_ch, :], p.astype(jnp.bfloat16),
                          preferred_element_type=jnp.float32))
            m_scr[h:h + 1, :] = m_new

    @pl.when(j == nj - 1)
    def _():
        bias = bias_ref[...]                                 # [out_dim, 1]
        # Clamp so isolated/padded nodes (l == 0) stay finite.
        l = jnp.maximum(l_scr[...], 1e-30)                   # [H, tq]
        if approx_recip:
            inv = pl.reciprocal(l, approx=True)
        else:
            inv = 1.0 / l                                    # exact on last layer
        tq = inv.shape[1]
        if concat:
            inv_full = jnp.concatenate(
                [jnp.broadcast_to(inv[h:h + 1, :], (out_ch, tq))
                 for h in range(heads)], axis=0)             # [H*C, tq]
            out_ref[...] = (acc_scr[...] * inv_full + bias).astype(out_ref.dtype)
        else:
            acc = acc_scr[0:out_ch, :] * inv[0:1, :]
            for h in range(1, heads):
                c0 = h * out_ch
                acc = acc + acc_scr[c0:c0 + out_ch, :] * inv[h:h + 1, :]
            out_ref[...] = (acc * (1.0 / heads) + bias).astype(out_ref.dtype)


# ----------------------------------------------------------------------------
# One GATConv layer = projection pallas_call + attention pallas_call.
# All node-indexed tensors are transposed (nodes on lanes).
# ----------------------------------------------------------------------------
def _gat_conv_layer(xT, adjT, counts, p, *, apply_elu, tq, tk,
                    out_dtype, approx_recip):
    heads, out_ch, concat = p["heads"], p["out_ch"], p["concat"]
    hc = heads * out_ch
    out_dim = hc if concat else out_ch
    fin, npad = xT.shape

    wT = p["w"].T.astype(jnp.bfloat16)                      # [hc, fin]
    attT = p["attT"]                                        # [2H, hc] f32

    # K (input-feature) tiling for the projection matmul.
    if fin <= 512:
        kf = fin
    else:
        kf = 256
        fpad = _round_up(fin, kf)
        if fpad != fin:
            xT = jnp.pad(xT, ((0, fpad - fin), (0, 0)))
            wT = jnp.pad(wT, ((0, 0), (0, fpad - fin)))
        fin = fpad
    nk = fin // kf

    xlT, aT = pl.pallas_call(
        functools.partial(_gat_proj_kernel, apply_elu=apply_elu),
        grid=(npad // tq, nk),
        in_specs=[
            pl.BlockSpec((kf, tq), lambda i, k: (k, i)),            # xT
            pl.BlockSpec((hc, kf), lambda i, k: (0, k)),            # W^T (bf16)
            pl.BlockSpec((2 * heads, hc), lambda i, k: (0, 0)),     # A^T (f32)
        ],
        out_specs=[
            pl.BlockSpec((hc, tq), lambda i, k: (0, i)),            # xl^T (bf16)
            pl.BlockSpec((2 * heads, tq), lambda i, k: (0, i)),     # [a_src;a_dst]^T
        ],
        out_shape=[
            jax.ShapeDtypeStruct((hc, npad), jnp.bfloat16),
            jax.ShapeDtypeStruct((2 * heads, npad), jnp.float32),
        ],
        scratch_shapes=[pltpu.VMEM((hc, tq), jnp.float32)],
        compiler_params=pltpu.CompilerParams(
            dimension_semantics=("parallel", "arbitrary"),
            vmem_limit_bytes=_VMEM_LIMIT),
    )(xT, wT, attT)

    a_src = aT[:heads].T                     # [npad, H]  (source coeff, columns)
    a_dstT = aT[heads:]                      # [H, npad]  (dest coeff, rows)

    outT = pl.pallas_call(
        functools.partial(_gat_attn_kernel, heads=heads, out_ch=out_ch,
                          concat=concat, approx_recip=approx_recip),
        grid_spec=pltpu.PrefetchScalarGridSpec(
            num_scalar_prefetch=1,
            grid=(npad // tq, npad // tk),
            in_specs=[
                pl.BlockSpec((tk, heads), lambda i, j, cnt: (j, 0)),    # a_src
                pl.BlockSpec((heads, tq), lambda i, j, cnt: (0, i)),    # a_dst^T
                pl.BlockSpec((tk, tq), lambda i, j, cnt: (j, i)),       # adj^T
                pl.BlockSpec((hc, tk), lambda i, j, cnt: (0, j)),       # xl^T
                pl.BlockSpec((out_dim, 1), lambda i, j, cnt: (0, 0)),   # bias
            ],
            out_specs=pl.BlockSpec((out_dim, tq), lambda i, j, cnt: (0, i)),
            scratch_shapes=[
                pltpu.VMEM((heads, tq), jnp.float32),   # running max
                pltpu.VMEM((heads, tq), jnp.float32),   # running denominator
                pltpu.VMEM((hc, tq), jnp.float32),      # running numerator
            ]),
        out_shape=jax.ShapeDtypeStruct((out_dim, npad), out_dtype),
        compiler_params=pltpu.CompilerParams(
            dimension_semantics=("parallel", "arbitrary"),
            vmem_limit_bytes=_VMEM_LIMIT),
    )(counts, a_src, a_dstT, adjT, xlT, p["bias"])
    return outT


def gat_forward(x, adj_int8, layers):
    """x: [N, F] f32; adj_int8: [N, N] int8, adj[i, j] = 1 iff edge j -> i
    (source j, target i) with self-loops (PyG GATConv add_self_loops)."""
    n = x.shape[0]
    npad, tq, tk = _pick_tiles(n)

    # Source-major adjacency adjT[src, dst], zero-padded.
    adjT = jnp.pad(adj_int8.T, ((0, npad - n), (0, npad - n)))
    xT = jnp.pad(x.astype(jnp.float32).T, ((0, 0), (0, npad - n)))

    # Per-(row-tile, source-tile) nonzero counts for empty-tile compute skip.
    nrow, nsrc = npad // tq, npad // tk
    counts = adjT.astype(jnp.int32).reshape(nsrc, tk, nrow, tq).sum(axis=(1, 3))
    counts = counts.T.reshape(-1)                           # [nrow * nsrc] int32

    h = xT
    nl = len(layers)
    # x = F.dropout(x, 0.6): identity in eval mode.
    for li, lp in enumerate(layers):
        last = li == nl - 1
        # elu + dropout precede every conv except the first one.
        h = _gat_conv_layer(h, adjT, counts, lp, apply_elu=(li > 0),
                            tq=tq, tk=tk,
                            out_dtype=jnp.float32 if last else jnp.bfloat16,
                            approx_recip=not last)
    return h[:, :n].T


# ----------------------------------------------------------------------------
# Parameter init (deterministic, glorot-style) + model assembly.
# ----------------------------------------------------------------------------
def _glorot(key, shape):
    fan_in, fan_out = shape[0], shape[-1]
    lim = math.sqrt(6.0 / (fan_in + fan_out))
    return jax.random.uniform(key, shape, jnp.float32, -lim, lim)


def _build_attT(att_src, att_dst):
    """Block-diagonal stack [att_src; att_dst] -> [2H, H*C] for the MXU."""
    heads, c = att_src.shape
    a = jnp.zeros((2 * heads, heads * c), jnp.float32)
    for h in range(heads):
        a = a.at[h, h * c:(h + 1) * c].set(att_src[h])
        a = a.at[heads + h, h * c:(h + 1) * c].set(att_dst[h])
    return a


def init_gatconv_params(key, in_ch, out_ch, heads, concat):
    k1, k2, k3 = jax.random.split(key, 3)
    out_dim = heads * out_ch if concat else out_ch
    att_src = _glorot(k2, (heads, out_ch))
    att_dst = _glorot(k3, (heads, out_ch))
    return dict(
        w=_glorot(k1, (in_ch, heads * out_ch)),
        att_src=att_src, att_dst=att_dst,
        attT=_build_attT(att_src, att_dst),
        bias=jnp.zeros((out_dim, 1), jnp.float32),
        heads=heads, out_ch=out_ch, concat=concat)


def build_gat(key, in_channels, hidden_channels, out_channels, heads,
              gnn_layers=3):
    keys = jax.random.split(key, gnn_layers)
    layers = [init_gatconv_params(keys[0], in_channels, hidden_channels,
                                  heads, True)]                 # start_conv
    for i in range(gnn_layers - 2):                             # middle convs
        layers.append(init_gatconv_params(keys[1 + i],
                                          hidden_channels * heads,
                                          hidden_channels, heads, True))
    layers.append(init_gatconv_params(keys[-1], hidden_channels * heads,
                                      out_channels, 1, False))  # end_conv
    return layers


# ----------------------------------------------------------------------------
# Pure-JAX references.
#   match_kernel=True : mirrors the kernel's precision choices (bf16 MXU
#                       inputs, bf16 inter-layer activations) -> tight band.
#   match_kernel=False: plain f32 math                         -> loose band.
# ----------------------------------------------------------------------------
def _elu(v):
    return jnp.where(v > 0, v, jnp.exp(jnp.minimum(v, 0.0)) - 1.0)


def _gat_conv_ref(x, adj, p, apply_elu, *, match_kernel):
    heads, C, concat = p["heads"], p["out_ch"], p["concat"]
    if match_kernel:
        xf = x.astype(jnp.float32)
        if apply_elu:
            xf = _elu(xf)
        xl = jnp.dot(xf.astype(jnp.bfloat16), p["w"].astype(jnp.bfloat16),
                     preferred_element_type=jnp.float32)
        xl_lo = xl.astype(jnp.bfloat16)
    else:
        if apply_elu:
            x = _elu(x)
        xl = x @ p["w"]
        xl_lo = xl
    valid = adj != 0
    outs = []
    for h in range(heads):
        xh = xl[:, h * C:(h + 1) * C]
        a_s = xh @ p["att_src"][h]
        a_d = xh @ p["att_dst"][h]
        s = a_d[:, None] + a_s[None, :]
        s = jnp.maximum(s, _LEAKY_SLOPE * s)
        s = jnp.where(valid, s, _NEG_INF)
        m = s.max(-1, keepdims=True)
        pexp = jnp.where(valid, jnp.exp(s - m), 0.0)
        denom = jnp.maximum(pexp.sum(-1, keepdims=True), 1e-30)
        if match_kernel:
            num = jnp.dot(pexp.astype(jnp.bfloat16), xl_lo[:, h * C:(h + 1) * C],
                          preferred_element_type=jnp.float32)
        else:
            num = pexp @ xh
        outs.append(num / denom)
    out = jnp.concatenate(outs, -1) if concat else sum(outs) / heads
    return out + p["bias"][:, 0]


def gat_forward_ref(x, adj, layers, *, match_kernel):
    h = x
    nl = len(layers)
    for li, lp in enumerate(layers):
        h = _gat_conv_ref(h, adj, lp, li > 0, match_kernel=match_kernel)
        if match_kernel and li < nl - 1:
            h = h.astype(jnp.bfloat16)        # kernel keeps hidden acts in bf16
    return h


# ----------------------------------------------------------------------------
if __name__ == "__main__":
    key = jax.random.PRNGKey(0)
    N = 16
    in_channels, hidden_channels, out_channels = 8, 8, 4
    heads, gnn_layers = 2, 3

    k_x, k_p = jax.random.split(key, 2)
    x = jax.random.normal(k_x, (N, in_channels), jnp.float32)

    # Deterministic small graph: ring + a few chords.
    # edge_index[0] = source nodes, edge_index[1] = target nodes (PyG layout).
    src = jnp.array(list(range(N)) + [0, 3, 5, 7, 9, 11], dtype=jnp.int32)
    dst = jnp.array([(i + 1) % N for i in range(N)] + [8, 12, 1, 2, 14, 6],
                    dtype=jnp.int32)
    edge_index = jnp.stack([src, dst])                        # [2, E]
    edge_type = jnp.zeros((edge_index.shape[1],), jnp.int32)  # non-relational: unused
    node_type = jnp.zeros((N,), jnp.int32)                    # non-relational: unused

    # Dense int8 adjacency (target-major) with self-loops (GATConv default).
    adj = jnp.zeros((N, N), jnp.int8).at[dst, src].set(1)
    adj = adj.at[jnp.arange(N), jnp.arange(N)].set(1)

    layers = build_gat(k_p, in_channels, hidden_channels, out_channels,
                       heads, gnn_layers)

    out = jax.block_until_ready(gat_forward(x, adj, layers))

    ref_match = gat_forward_ref(x, adj, layers, match_kernel=True)
    ref_f32 = gat_forward_ref(x, adj, layers, match_kernel=False)

    assert out.shape == (N, out_channels), out.shape
    assert bool(jnp.all(jnp.isfinite(out)))
    assert bool(jnp.allclose(out, ref_match, rtol=1e-2, atol=1e-2)), (
        float(jnp.max(jnp.abs(out - ref_match))))
    assert bool(jnp.allclose(out, ref_f32, rtol=1e-1, atol=1e-1)), (
        float(jnp.max(jnp.abs(out - ref_f32))))
    print("KERNEL_OK")
</pallas_src>

<mosaic_0001>
module attributes {stable_mosaic.version = 11 : i64} {
  func.func @_gat_proj_kernel(%arg0: i32, %arg1: i32, %arg2: memref<8x128xf32, #tpu.memory_space<vmem>>, %arg3: memref<16x8xbf16, #tpu.memory_space<vmem>>, %arg4: memref<4x16xf32, #tpu.memory_space<vmem>>, %arg5: memref<16x128xbf16, #tpu.memory_space<vmem>>, %arg6: memref<4x128xf32, #tpu.memory_space<vmem>>, %arg7: memref<16x128xf32, #tpu.memory_space<vmem>>) attributes {dimension_semantics = [#tpu.dimension_semantics<parallel>, #tpu.dimension_semantics<arbitrary>], iteration_bounds = array<i64: 2, 1>, scalar_prefetch = 0 : i64, scratch_operands = 1 : i64, tpu.core_type = #tpu.core_type<tc>, window_params = [{transform_indices = @transform_0, window_bounds = array<i64: 8, 128>}, {transform_indices = @transform_1, window_bounds = array<i64: 16, 8>}, {pipeline_mode = #tpu.pipeline_mode<synchronous>, transform_indices = @transform_2, window_bounds = array<i64: 4, 16>}, {transform_indices = @transform_3, window_bounds = array<i64: 16, 128>}, {transform_indices = @transform_4, window_bounds = array<i64: 4, 128>}]} {
    %c0_i32 = arith.constant 0 : i32
    %0 = arith.cmpi eq, %arg1, %c0_i32 : i32
    %1 = arith.extui %0 : i1 to i32
    %c0_i32_0 = arith.constant 0 : i32
    %2 = arith.cmpi ne, %1, %c0_i32_0 : i32
    scf.if %2 {
      %cst_10 = arith.constant 0.000000e+00 : f32
      %13 = vector.broadcast %cst_10 : f32 to vector<16x128xf32>
      %c0_11 = arith.constant 0 : index
      %c0_12 = arith.constant 0 : index
      %14 = vector.load %arg7[%c0_11, %c0_12] : memref<16x128xf32, #tpu.memory_space<vmem>>, vector<16x128xf32>
      tpu.vector_store %arg7[%c0_11, %c0_12], %13 {strides = array<i32>} : memref<16x128xf32, #tpu.memory_space<vmem>>, vector<16x128xf32>,
    } else {
    }
    %c0 = arith.constant 0 : index
    %c0_1 = arith.constant 0 : index
    %3 = vector.load %arg2[%c0, %c0_1] : memref<8x128xf32, #tpu.memory_space<vmem>>, vector<8x128xf32>
    %c0_2 = arith.constant 0 : index
    %c0_3 = arith.constant 0 : index
    %4 = vector.load %arg7[%c0_2, %c0_3] : memref<16x128xf32, #tpu.memory_space<vmem>>, vector<16x128xf32>
    %c0_4 = arith.constant 0 : index
    %c0_5 = arith.constant 0 : index
    %5 = vector.load %arg3[%c0_4, %c0_5] : memref<16x8xbf16, #tpu.memory_space<vmem>>, vector<16x8xbf16>
    %6 = arith.truncf %3 : vector<8x128xf32> to vector<8x128xbf16>
    %cst = arith.constant dense<0.000000e+00> : vector<16x128xf32>
    %7 = tpu.matmul %5, %6, %cst {dimension_numbers = #tpu.dot_dimension_numbers<[1], [0], [0], [1], [0, 0, 1, 1], [], []>} : vector<16x8xbf16>, vector<8x128xbf16>, vector<16x128xf32> -> vector<16x128xf32>
    %8 = arith.addf %4, %7 : vector<16x128xf32>
    %c0_6 = arith.constant 0 : index
    %c0_7 = arith.constant 0 : index
    %9 = vector.load %arg7[%c0_6, %c0_7] : memref<16x128xf32, #tpu.memory_space<vmem>>, vector<16x128xf32>
    tpu.vector_store %arg7[%c0_6, %c0_7], %8 {strides = array<i32>} : memref<16x128xf32, #tpu.memory_space<vmem>>, vector<16x128xf32>,
    %c0_i32_8 = arith.constant 0 : i32
    %10 = arith.cmpi eq, %arg1, %c0_i32_8 : i32
    %11 = arith.extui %10 : i1 to i32
    %c0_i32_9 = arith.constant 0 : i32
    %12 = arith.cmpi ne, %11, %c0_i32_9 : i32
    scf.if %12 {
      %c0_10 = arith.constant 0 : index
      %c0_11 = arith.constant 0 : index
      %13 = vector.load %arg7[%c0_10, %c0_11] : memref<16x128xf32, #tpu.memory_space<vmem>>, vector<16x128xf32>
      %14 = arith.truncf %13 : vector<16x128xf32> to vector<16x128xbf16>
      %c0_12 = arith.constant 0 : index
      %c0_13 = arith.constant 0 : index
      %15 = vector.load %arg5[%c0_12, %c0_13] : memref<16x128xbf16, #tpu.memory_space<vmem>>, vector<16x128xbf16>
      tpu.vector_store %arg5[%c0_12, %c0_13], %14 {strides = array<i32>} : memref<16x128xbf16, #tpu.memory_space<vmem>>, vector<16x128xbf16>,
      %c0_14 = arith.constant 0 : index
      %c0_15 = arith.constant 0 : index
      %16 = vector.load %arg4[%c0_14, %c0_15] : memref<4x16xf32, #tpu.memory_space<vmem>>, vector<4x16xf32>
      %cst_16 = arith.constant dense<0.000000e+00> : vector<4x128xf32>
      %17 = tpu.matmul %16, %13, %cst_16 {dimension_numbers = #tpu.dot_dimension_numbers<[1], [0], [0], [1], [0, 0, 1, 1], [], []>} : vector<4x16xf32>, vector<16x128xf32>, vector<4x128xf32> -> vector<4x128xf32>
      %c0_17 = arith.constant 0 : index
      %c0_18 = arith.constant 0 : index
      %18 = vector.load %arg6[%c0_17, %c0_18] : memref<4x128xf32, #tpu.memory_space<vmem>>, vector<4x128xf32>
      tpu.vector_store %arg6[%c0_17, %c0_18], %17 {strides = array<i32>} : memref<4x128xf32, #tpu.memory_space<vmem>>, vector<4x128xf32>,
    } else {
    }
    return
  }
  func.func @transform_0(%arg0: i32, %arg1: i32) -> (i32, i32) {
    %c0_i32 = arith.constant 0 : i32
    return %arg1, %arg0 : i32, i32
  }
  func.func @transform_1(%arg0: i32, %arg1: i32) -> (i32, i32) {
    %c0_i32 = arith.constant 0 : i32
    %c0_i32_0 = arith.constant 0 : i32
    return %c0_i32, %arg1 : i32, i32
  }
  func.func @transform_2(%arg0: i32, %arg1: i32) -> (i32, i32) {
    %c0_i32 = arith.constant 0 : i32
    %c0_i32_0 = arith.constant 0 : i32
    %c0_i32_1 = arith.constant 0 : i32
    return %c0_i32, %c0_i32_0 : i32, i32
  }
  func.func @transform_3(%arg0: i32, %arg1: i32) -> (i32, i32) {
    %c0_i32 = arith.constant 0 : i32
    %c0_i32_0 = arith.constant 0 : i32
    return %c0_i32, %arg0 : i32, i32
  }
  func.func @transform_4(%arg0: i32, %arg1: i32) -> (i32, i32) {
    %c0_i32 = arith.constant 0 : i32
    %c0_i32_0 = arith.constant 0 : i32
    return %c0_i32, %arg0 : i32, i32
  }
}

</mosaic_0001>

<bundles_post_ra>
// kernel: tpu_custom_call.1
= control target key start
LH: loop header
LB: loop body
LE: loop exit
PB: predicated region body
PF: predicated region fallthrough
CT: control target
= control target key end

     0   :  { %10 = vsyncpa [#allocation4], 0  ;;  %s1060_s0 = inlined_call_operand.hbm [shape: f32[8,256], index: 0, kind: input, shape index: {}]   ;;  %s1061_s1 = inlined_call_operand.vmem [shape: bf16[16,8], index: 1, kind: input, shape index: {}]   ;;  %s1062_s2 = inlined_call_operand.vmem [shape: f32[4,16], index: 2, kind: input, shape index: {}]   ;;  %s1063_s3 = inlined_call_operand.hbm [shape: bf16[16,256], index: 3, kind: output, shape index: {0}]   ;;  %s1064_s4 = inlined_call_operand.hbm [shape: f32[4,256], index: 4, kind: output, shape index: {1}]  }
   0x1   :  { %12 = vsyncpa [#allocation4 + $0x1], 0 }
   0x2   :  { %13 = vsyncpa [#allocation5], 0 }
   0x3   :  { %15 = vsyncpa [#allocation5 + $0x1], 0 }
   0x4   :  { %16 = vsyncpa [#allocation8], 0 }
   0x5   :  { %18 = vsyncpa [#allocation8 + $0x1], 0  ;;  %s873_s15 = smov 0   ;;  %s875_s16 = smov 0  }
   0x6   :  { %s877_s17 = smov 0   ;;  %s879_s18 = smov 0  }
   0x7   :  { %s881_s19 = smov 0   ;;  %s883_s20 = smov 0  }
   0x8 LB: > { %s580_s21 = sadd.s32 4294967295, %s838_s20   ;;  %s581_s22 = sadd.s32 4294967294, %s838_s20   ;;  %s838_s20 = sphi %s883_s20, %s24_s20   ;;  %s834_s19 = sphi %s881_s19, %s1076_s19   ;;  %s830_s18 = sphi %s879_s18, %s1075_s18   ;;  %s826_s17 = sphi %s877_s17, %s1074_s17   ;;  %s822_s16 = sphi %s875_s16, %s1073_s16   ;;  %s818_s15 = sphi %s873_s15, %s1072_s15  }
   0x9   : > { %s36_s23 = sadd.s32 1, %s834_s19  ;;  %s45_s24 = sadd.s32 1, %s826_s17 }
   0xa   : > { %p38_p0 = scmp.ge.s32.totalorder %s36_s23, 2  ;;  %p52_p1 = scmp.ne.s32.totalorder %s826_s17, %s822_s16 }
   0xb   : > { %p53_p2 = scmp.eq.s32.totalorder %s838_s20, 0  ;;  %p58_p3 = scmp.ne.s32.totalorder %s822_s16, %s818_s15 }
   0xc   : > { %s1078_s23 = smov (%p38_p0, %s36_s23), 0  ;;  %p59_p5 = scmp.eq.s32.totalorder %s580_s21, 0 }
   0xd   : > { %p914_p4 = por %p53_p2, %p52_p1  ;;  %s41_s26 = ssub.s32 %s834_s19, %s1078_s23 }
   0xe   : > { %p129_p6 = scmp.eq.s32.totalorder %s580_s21, 1  ;;  %p43_p7 = scmp.eq.s32.totalorder %s41_s26, 0 }
   0xf   : > { %p920_p8 = por %p59_p5, %p58_p3  ;;  %p135_p10 = scmp.eq.s32.totalorder %s581_s22, 1 }
  0x10   : > { %p924_p9 = por %p129_p6, %p52_p1  ;;  %p644_p13 = scmp.lt.s32.totalorder %s838_s20, 2 }
  0x11   : > { %s929_s29 = scalar_select %p43_p7, %s826_s17, %s45_s24  }
  0x12   : > { %p931_p11 = por %p135_p10, %p58_p3  ;;  %s191_s5 = sand.u32 1, %s826_s17  }
  0x13   : > { %s585_s6 = sshll.u32 %s191_s5, 3  ;;  %s586_s7 = sshll.u32 %s834_s19, 7 }
  0x14   : > { %s1068_s30 = scalar_select %p931_p11, 1, 0 }
  0x15   : > { %s202_s10 = scalar_lea.hbm %s1060_s0, %s586_s7  ;;  %s195_s11 = scalar_lea.vmem [#allocation3], %s585_s6 }
  0x16   : > { %s204_s12 = sshll.u32 %s195_s11, 4  ;;  %p944_p0 = pnand %p644_p13, %p914_p4  ;;  %s205_s12 = int_to_ptr.vmem [resolvable:$true] %s204_s12 }
  0x17   : > { %p587_p1 = scmp.ge.s32.totalorder %s838_s20, 1  ;;  %p209_p2 = scmp.lt.s32.totalorder %s838_s20, 3 }
  0x18   : > { %s192_s14 = scalar_lea.sflag [#allocation4], %s191_s5  ;;  %p702_p3 = pneg %p944_p0 }
  0x19   : > { %s713_s21 = scalar_lea.vmem %s205_s12, 128  ;;  %s840_s22 = smov [#allocation3]  }
  0x1a   : > { %p714_p5 = scmp.ne.s32.totalorder %s205_s12, %s713_s21  ;;  %s718_s24 = sshll.u32 %s840_s22, 4  ;;  %s719_s24 = int_to_ptr.vmem [resolvable:$false] %s718_s24 }
  0x1b   : > { %s720_s26 = scalar_lea.vmem %s719_s24, 256  ;;  %p721_p10 = scmp.lt.s32.totalorder %s205_s12, %s719_s24 }
  0x1c   : > { %p716_p6 = pnand %p714_p5, %p702_p3  ;;  %p722_p12 = scmp.lt.s32.totalorder %s720_s26, %s713_s21 }
  0x1e   : > { %p717_p7 = pneg %p716_p6  ;;  %p723_p4 = por %p722_p12, %p721_p10 }
  0x20   : > { %p724_p13 = pnand %p723_p4, %p717_p7 }
  0x22   : > { %727 = shalt.err (!%p724_p13)
}
  0x23   : > { %636 = dma.hbm_to_vmem [thread:$0]  (!%p944_p0), %s202_s10, 128, %s205_s12, %s192_s14  }
  0x24   : > { %p210_p11 = pnand %p587_p1, %p209_p2 }
  0x25   : > { %s959_s25 = sand.u32 (!%p210_p11), 1, %s822_s16  }
  0x26   : > { %213 = sbr.rel (%p210_p11) target bundleno = 458 (0x1ca), region = 32  ;;  %s588_s5 = sshll.u32 (!%p210_p11), %s959_s25, 3 }
  0x27   : > { %s216_s6 = scalar_lea.sflag (!%p210_p11), [#allocation4], %s959_s25  ;;  %s219_s7 = scalar_lea.vmem (!%p210_p11), [#allocation3], %s588_s5 }
  0x2b   : > { %805 = dma.done.wait (%p920_p8), %s216_s6, 128  }
  0x2c   : > { %807 = vsyncadd (%p920_p8), %s216_s6, 4294967168  ;;  %v841_v0 = vmov 0.0   ;;  %vm842_vm0 = vmmov 0   ;;  %v264_v1 = vld [vmem:[%s219_s7] sm:$0xff]  ;;  %vm279_vm1 = vcmask 1043456   ;;  %vm275_vm2 = vcmask 64512  }
  0x2d   : > { %614 = vmatprep.subr.bf16.mxu0 %v841_v0  ;;  %616 = vmatprep.mubr.msk.bf16.mxu0 %vm842_vm0, %v841_v0  ;;  %v269_v2 = vpack.c.bf16 %v264_v1, %v264_v1  ;;  %v699_v4 = vld [vmem:[%s1061_s1] sm:$0xff]   ;;  %vm344_vm3 = vcmask 130048   ;;  %s245_s11 = scalar_lea.vmem [#allocation6], %s588_s5  ;;  %s598_s13 = sshll.u32 %s830_s18, 6 }
  0x2e   : > { %620 = vmatprep.subr.mxu1 %v841_v0  ;;  %624 = vmatprep.mubr.msk.f32.mxu1 %vm842_vm0, %v841_v0  ;;  %v343_v9 = vld [vmem:[%s1062_s2] sm:$0xf]  ;;  %s437_s12 = sshll.u32 %s245_s11, 4  ;;  %s981_s22 = scalar_lea.hbm %s1063_s3, %s598_s13  ;;  %s974_s12 = int_to_ptr.vmem [resolvable:$true] %s437_s12 }
  0x2f   : > { %v281_v3 = vsel %vm279_vm1, %v269_v2, 0  ;;  %s420_s24 = scalar_lea.sflag [#allocation5], %s959_s25  ;;  %s728_s26 = scalar_lea.vmem %s974_s12, 128 }
  0x30   : > { %615 = vmatpush3.bf16.msra.mxu0 %v281_v3  ;;  %p729_p8 = scmp.ne.s32.totalorder %s974_s12, %s728_s26  ;;  %s843_s5 = smov [#allocation6]  }
  0x31   : > { %s732_s6 = sshll.u32 %s843_s5, 4  ;;  %s733_s6 = int_to_ptr.vmem [resolvable:$false] %s732_s6 }
  0x32   : > { %p730_p11 = pnand %p729_p8, %p924_p9  ;;  %s734_s7 = scalar_lea.vmem %s733_s6, 256 }
  0x33   : > { %617 = vmatmul.mubr.msk.bf16.vlgmr.msra.gmra.mxu0 %vm275_vm2, %v699_v4  ;;  %p735_p0 = scmp.lt.s32.totalorder %s974_s12, %s733_s6  ;;  %p736_p1 = scmp.lt.s32.totalorder %s734_s7, %s728_s26 }
  0x34   : > { %p731_p12 = pneg %p730_p11 }
  0x35   : > { %p737_p2 = por %p736_p1, %p735_p0 }
  0x37   : > { %p738_p3 = pnand %p737_p2, %p731_p12 }
  0xf3   : > { %v317_v5 = vpop.f32.mrf.mxu0 }
  0xf5   : > { %v618_v6 = vpop.f32.mrf.mxu0 }
  0xf7   : > { %v320_v7 = vpop.f32.mrf.mxu0 }
  0xf8   : > { %v607_v8 = vpack.c.bf16 %v320_v7, %v317_v5  ;;  %621 = vmatpush3.msra.mxu1 %v320_v7 }
  0xf9   : > { %v619_v10 = vpop.f32.mrf.mxu0  ;;  %622 = vmatprep.subr.mxu1 %v841_v0 }
  0xfa   : > { %608 = vst [vmem:[%s245_s11] sm:$0xff] %v607_v8   ;;  %623 = vmatpush3.msra.mxu1 %v317_v5 }
  0xfb   : > { %625 = vmatmul.mubr.msk.f32.vlgmr.msra.gmra.mxu1 %vm344_vm3, %v343_v9 }
  0xfc   : > { %741 = shalt.err (!%p738_p3)
}
  0xfd   : > { %s742_s8 = scalar_lea.hbm %s981_s22, 128  ;;  %s746_s10 = scalar_lea.hbm %s1063_s3, 256 }
  0xfe   : > { %p743_p5 = scmp.ne.s32.totalorder %s981_s22, %s742_s8  ;;  %p747_p10 = scmp.lt.s32.totalorder %s981_s22, %s1063_s3 }
  0xff   : > { %p748_p4 = scmp.lt.s32.totalorder %s746_s10, %s742_s8 }
 0x100   : > { %p744_p6 = pnand %p743_p5, %p924_p9 }
 0x101   : > { %p749_p13 = por %p748_p4, %p747_p10 }
 0x102   : > { %p745_p7 = pneg %p744_p6 }
 0x104   : > { %p750_p8 = pnand %p749_p13, %p745_p7 }
 0x106   : > { %753 = shalt.err (!%p750_p8)
}
 0x107   : > { %s844_s21 = smov 64   ;;  %s845_s26 = smov 128  }
 0x108   : > { %s846_s5 = smov 4   ;;  %s590_s6 = sshll.u32 %s959_s25, 2 }
 0x109   : > { %629 = dma.vmem_to_hbm [thread:$0]  (%p924_p9), %s974_s12, 128, %s981_s22, %s420_s24, %s844_s21, %s845_s26, %s846_s5  }
 0x10a   : > { %s252_s7 = scalar_lea.vmem [#allocation7], %s590_s6  ;;  %s1014_s10 = scalar_lea.hbm %s1064_s4, %s598_s13 }
 0x10b   : > { %s453_s8 = sshll.u32 %s252_s7, 4  ;;  %s425_s11 = scalar_lea.sflag [#allocation8], %s959_s25  ;;  %s1007_s8 = int_to_ptr.vmem [resolvable:$true] %s453_s8 }
 0x10c   : > { %s754_s14 = scalar_lea.vmem %s1007_s8, 64  ;;  %s847_s12 = smov [#allocation7]  }
 0x10d   : > { %p755_p11 = scmp.ne.s32.totalorder %s1007_s8, %s754_s14  ;;  %s758_s22 = sshll.u32 %s847_s12, 4  ;;  %s759_s22 = int_to_ptr.vmem [resolvable:$false] %s758_s22 }
 0x10e   : > { %s760_s18 = scalar_lea.vmem %s759_s22, 128  ;;  %p761_p1 = scmp.lt.s32.totalorder %s1007_s8, %s759_s22 }
 0x10f   : > { %p756_p12 = pnand %p755_p11, %p924_p9  ;;  %p762_p2 = scmp.lt.s32.totalorder %s760_s18, %s754_s14 }
 0x111   : > { %p757_p0 = pneg %p756_p12  ;;  %p763_p3 = por %p762_p2, %p761_p1 }
 0x113   : > { %p764_p5 = pnand %p763_p3, %p757_p0 }
 0x1bb   : > { %v414_v11 = vpop.f32.mrf.mxu1 }
 0x1bc   : > { %418 = vst [vmem:[%s252_s7] sm:$0xf] %v414_v11 }
 0x1bd   : > { %v626_v12 = vpop.f32.mrf.mxu1 }
 0x1be   : > { %767 = shalt.err (!%p764_p5)
}
 0x1bf   : > { %s768_s13 = scalar_lea.hbm %s1014_s10, 64  ;;  %s772_s21 = scalar_lea.hbm %s1064_s4, 128 }
 0x1c0   : > { %p769_p6 = scmp.ne.s32.totalorder %s1014_s10, %s768_s13  ;;  %p773_p4 = scmp.lt.s32.totalorder %s1014_s10, %s1064_s4 }
 0x1c1   : > { %p774_p13 = scmp.lt.s32.totalorder %s772_s21, %s768_s13 }
 0x1c2   : > { %p770_p7 = pnand %p769_p6, %p924_p9 }
 0x1c3   : > { %p775_p8 = por %p774_p13, %p773_p4 }
 0x1c4   : > { %p771_p10 = pneg %p770_p7 }
 0x1c6   : > { %p776_p11 = pnand %p775_p8, %p771_p10 }
 0x1c8   : > { %779 = shalt.err (!%p776_p11)
}
 0x1c9   : > { %630 = dma.vmem_to_hbm [thread:$0]  (%p924_p9), %s1007_s8, 64, %s1014_s10, %s425_s11  }
 0x1ca PF: > { %s465_s6 = sand.u32 1, %s818_s15   ;;  %p1070_p12 = scmp.ne.s32.totalorder %s1068_s30, 0 }
 0x1cb   : > { %p1071_p0 = scmp.ge.s32.totalorder %s838_s20, 2  ;;  %s466_s7 = scalar_lea.sflag [#allocation5], %s465_s6 }
 0x1cd   : > { %p638_p1 = pnand %p1071_p0, %p1070_p12 }
 0x1cf   : > { %p639_p2 = pneg %p638_p1 }
 0x1d1   : > { %809 = dma.done.wait (%p639_p2), %s466_s7, 128  }
 0x1d2   : > { %811 = vsyncadd (%p639_p2), %s466_s7, 4294967168  ;;  %s475_s9 = scalar_lea.sflag [#allocation8], %s465_s6 }
 0x1d3   : > { %813 = dma.done.wait (%p639_p2), %s475_s9, 64  }
 0x1d4   : > { %815 = vsyncadd (%p639_p2), %s475_s9, 4294967232  ;;  %s24_s20 = sadd.s32 1, %s838_s20   ;;  %s1072_s15 = smov %s822_s16 }
 0x1d5   : > { %p21_p3 = scmp.ge.s32.totalorder %s24_s20, 4   ;;  %s1073_s16 = smov %s826_s17 }
 0x1d6   : > { %s1074_s17 = smov %s929_s29  ;;  %s1075_s18 = smov %s834_s19 }
 0x1d7   : > { %s1076_s19 = smov %s1078_s23  ;;  %23 = sbr.rel (!%p21_p3) target bundleno = 8 (0x8), region = 105 }
 0x1dc   :  { %480 = vsyncpa [#allocation4], 1 }
 0x1dd   :  { %482 = vsyncpa [#allocation4 + $0x1], 1 }
 0x1de   :  { %483 = vsyncpa [#allocation5], 1 }
 0x1df   :  { %485 = vsyncpa [#allocation5 + $0x1], 1 }
 0x1e0   :  { %486 = vsyncpa [#allocation8], 1 }
 0x1e1   :  { %488 = vsyncpa [#allocation8 + $0x1], 1 }

</bundles_post_ra>
